<compile_context>
chip_gen: v7x
topology: tpu7x:2x2x1
jax: 0.10.0
libtpu: 0.0.40
codegen_flags: <defaults>
</compile_context>

<pallas_src>
import functools

import jax
import jax.numpy as jnp
from jax.experimental import pallas as pl
from jax.experimental.pallas import tpu as pltpu


# ----------------------------------------------------------------------------
# Helpers
# ----------------------------------------------------------------------------
def _round_down(x, m):
    return (x // m) * m


def _vmem_settings():
    """(block_budget_bytes, vmem_limit_bytes) chosen per TPU generation."""
    # Conservative default: safe on every supported generation (v7x: 64 MiB/TC).
    budget, limit = 36 * 1024 * 1024, 56 * 1024 * 1024
    try:
        kind = jax.devices()[0].device_kind.lower()
    except Exception:  # pragma: no cover - no accelerator visible
        kind = ""
    if "v2" in kind or "v3" in kind:
        # 16 MiB VMEM parts.
        budget, limit = 10 * 1024 * 1024, 14 * 1024 * 1024
    elif "7" not in kind and any(t in kind for t in ("v4", "v5", "v6")):
        # v4 / v5e / v5p / v6e: 128 MiB physical VMEM -> use most of it.
        budget, limit = 64 * 1024 * 1024, 96 * 1024 * 1024
    # If the runtime can tell us the real capacity, only ever shrink.
    try:
        cap = int(pltpu.get_tpu_info().vmem_capacity_bytes)
        limit = min(limit, cap * 7 // 8)
        budget = min(budget, cap * 5 // 8)
    except Exception:
        pass
    return budget, limit


# ----------------------------------------------------------------------------
# Single-pass kernel: full batch column block per grid step
# ----------------------------------------------------------------------------
def _sync_bn_kernel(x_ref, w_ref, b_ref, o_ref, *, eps):
    # x_ref: (N, TILE_D) block; w_ref / b_ref: (1, TILE_D)
    xf = x_ref[...].astype(jnp.float32)
    inv_n = jnp.float32(1.0 / xf.shape[0])

    mean = jnp.sum(xf, axis=0, keepdims=True) * inv_n            # (1, TILE_D)
    sqr_mean = jnp.sum(xf * xf, axis=0, keepdims=True) * inv_n   # (1, TILE_D)

    # world_size == 1: all-reduce-sum * (1/world_size) is the identity (elided).
    # Clamp: E[x^2]-E[x]^2 can go slightly negative (cancellation / pad lanes).
    var = jnp.maximum(sqr_mean - mean * mean, 0.0)
    inv_std = jax.lax.rsqrt(var + jnp.float32(eps))               # EUP rsqrt

    scale = w_ref[...].astype(jnp.float32) * inv_std
    shift = b_ref[...].astype(jnp.float32) - mean * scale
    o_ref[...] = (xf * scale + shift).astype(o_ref.dtype)


def _sync_bn_single_pass(batch, weight, bias, eps, budget, vmem_limit):
    n, d = batch.shape
    itemsize = jnp.dtype(batch.dtype).itemsize
    # Live VMEM per feature column: 2x double-buffered (N, TILE_D) blocks
    # (input + output) at the input dtype, ~2 f32-wide elementwise temporaries
    # (covers the bf16->f32 upcast), plus double-buffered f32 weight/bias rows.
    per_col = n * (4 * itemsize + 8) + 16

    if d <= 128:
        tile_d = d
    else:
        tile_d = min(d, max(128, _round_down(budget // per_col, 128)))
    grid_d = pl.cdiv(d, tile_d)

    w2 = weight.reshape(1, d)
    b2 = bias.reshape(1, d)

    kernel = functools.partial(_sync_bn_kernel, eps=float(eps))

    return pl.pallas_call(
        kernel,
        out_shape=jax.ShapeDtypeStruct((n, d), batch.dtype),
        grid_spec=pltpu.PrefetchScalarGridSpec(
            num_scalar_prefetch=0,
            grid=(grid_d,),
            in_specs=[
                pl.BlockSpec((n, tile_d), lambda j: (0, j)),   # x column block
                pl.BlockSpec((1, tile_d), lambda j: (0, j)),   # weight
                pl.BlockSpec((1, tile_d), lambda j: (0, j)),   # bias
            ],
            out_specs=pl.BlockSpec((n, tile_d), lambda j: (0, j)),
        ),
        compiler_params=pltpu.CompilerParams(
            # D tiles are independent -> shard across TensorCores on v7x.
            dimension_semantics=("parallel",),
            vmem_limit_bytes=vmem_limit,
        ),
    )(batch, w2, b2)


# ----------------------------------------------------------------------------
# Two-pass path for large N (stats accumulation + streaming normalize)
# ----------------------------------------------------------------------------
def _stats_kernel(x_ref, w_ref, b_ref, scale_ref, shift_ref, sum_sc, sq_sc,
                  *, eps, n_total, tile_n, mask_rows):
    i = pl.program_id(1)   # N-tile index (innermost, reduction axis)

    @pl.when(i == 0)
    def _():
        sum_sc[...] = jnp.zeros_like(sum_sc)
        sq_sc[...] = jnp.zeros_like(sq_sc)

    xf = x_ref[...].astype(jnp.float32)                 # (TILE_N, TILE_D)
    if mask_rows:
        # Zero rows past the true batch size in the ragged last N tile.
        row = jax.lax.broadcasted_iota(jnp.int32, (xf.shape[0], 1), 0)
        valid = (row + i * tile_n) < n_total
        xf = jnp.where(valid, xf, 0.0)
    sum_sc[...] = sum_sc[...] + jnp.sum(xf, axis=0, keepdims=True)
    sq_sc[...] = sq_sc[...] + jnp.sum(xf * xf, axis=0, keepdims=True)

    @pl.when(i == pl.num_programs(1) - 1)
    def _():
        inv_n = jnp.float32(1.0 / n_total)
        mean = sum_sc[...] * inv_n
        var = jnp.maximum(sq_sc[...] * inv_n - mean * mean, 0.0)
        inv_std = jax.lax.rsqrt(var + jnp.float32(eps))
        scale = w_ref[...].astype(jnp.float32) * inv_std
        scale_ref[...] = scale
        shift_ref[...] = b_ref[...].astype(jnp.float32) - mean * scale


def _normalize_kernel(x_ref, scale_ref, shift_ref, o_ref):
    xf = x_ref[...].astype(jnp.float32)
    o_ref[...] = (xf * scale_ref[...] + shift_ref[...]).astype(o_ref.dtype)


def _sync_bn_two_pass(batch, weight, bias, eps, budget, vmem_limit):
    n, d = batch.shape
    itemsize = jnp.dtype(batch.dtype).itemsize

    tile_d = d if d <= 512 else 512
    # Live VMEM per element of a (TILE_N, TILE_D) block: double-buffered
    # in + out at the input dtype plus ~2 f32-wide temporaries.
    per_elem = 4 * itemsize + 8
    tile_n = _round_down(budget // (tile_d * per_elem), 8)
    tile_n = max(8, min(tile_n, max(8, _round_down(n, 8))))

    grid_d = pl.cdiv(d, tile_d)
    grid_n = pl.cdiv(n, tile_n)
    mask_rows = (n % tile_n) != 0

    w2 = weight.reshape(1, d)
    b2 = bias.reshape(1, d)

    stats = functools.partial(
        _stats_kernel, eps=float(eps), n_total=n, tile_n=tile_n,
        mask_rows=mask_rows)

    # Pass 1: per-feature sum / sum-of-squares -> folded (1, D) scale / shift.
    scale, shift = pl.pallas_call(
        stats,
        out_shape=(jax.ShapeDtypeStruct((1, d), jnp.float32),
                   jax.ShapeDtypeStruct((1, d), jnp.float32)),
        grid_spec=pltpu.PrefetchScalarGridSpec(
            num_scalar_prefetch=0,
            grid=(grid_d, grid_n),                 # reduction (N) axis last
            in_specs=[
                pl.BlockSpec((tile_n, tile_d), lambda j, i: (i, j)),
                pl.BlockSpec((1, tile_d), lambda j, i: (0, j)),
                pl.BlockSpec((1, tile_d), lambda j, i: (0, j)),
            ],
            out_specs=(pl.BlockSpec((1, tile_d), lambda j, i: (0, j)),
                       pl.BlockSpec((1, tile_d), lambda j, i: (0, j))),
            scratch_shapes=[pltpu.VMEM((1, tile_d), jnp.float32),
                            pltpu.VMEM((1, tile_d), jnp.float32)],
        ),
        compiler_params=pltpu.CompilerParams(
            dimension_semantics=("parallel", "arbitrary"),
            vmem_limit_bytes=vmem_limit,
        ),
    )(batch, w2, b2)

    # Pass 2: stream x again and apply y = x * scale + shift.
    return pl.pallas_call(
        _normalize_kernel,
        out_shape=jax.ShapeDtypeStruct((n, d), batch.dtype),
        grid_spec=pltpu.PrefetchScalarGridSpec(
            num_scalar_prefetch=0,
            grid=(grid_d, grid_n),
            in_specs=[
                pl.BlockSpec((tile_n, tile_d), lambda j, i: (i, j)),
                pl.BlockSpec((1, tile_d), lambda j, i: (0, j)),
                pl.BlockSpec((1, tile_d), lambda j, i: (0, j)),
            ],
            out_specs=pl.BlockSpec((tile_n, tile_d), lambda j, i: (i, j)),
        ),
        compiler_params=pltpu.CompilerParams(
            dimension_semantics=("parallel", "parallel"),
            vmem_limit_bytes=vmem_limit,
        ),
    )(batch, scale, shift)


# ----------------------------------------------------------------------------
# Public wrapper
# ----------------------------------------------------------------------------
def xla_sync_bn(batch, weight, bias, *, eps=1e-5, world_size=1,
                two_pass=None, max_block_budget_bytes=None):
    """Pallas implementation of XLASyncBNTrainModeOnly.forward (train mode).

    two_pass / max_block_budget_bytes are testing knobs (None = automatic).
    """
    assert batch.ndim == 2
    # A world_size > 1 path without a real cross-device all-reduce would be
    # semantically wrong (it would just shrink the local mean).
    # TODO(synk): world_size > 1 -> all-reduce (sum, sqr_sum) across devices
    #             with pltpu.make_async_remote_copy + get_barrier_semaphore.
    assert world_size == 1, "multi-device all-reduce not implemented"
    n, d = batch.shape
    assert weight.shape == (d,) and bias.shape == (d,)

    budget, vmem_limit = _vmem_settings()
    if max_block_budget_bytes is not None:
        budget = int(max_block_budget_bytes)

    itemsize = jnp.dtype(batch.dtype).itemsize
    per_col = n * (4 * itemsize + 8) + 16     # single-pass VMEM per feature col
    min_tile_d = d if d <= 128 else 128
    fits_single = per_col * min_tile_d <= budget

    if two_pass is None:
        use_two_pass = not fits_single
    else:
        use_two_pass = bool(two_pass) and n >= 8

    if use_two_pass:
        return _sync_bn_two_pass(batch, weight, bias, eps, budget, vmem_limit)
    return _sync_bn_single_pass(batch, weight, bias, eps, budget, vmem_limit)


# ----------------------------------------------------------------------------
# Reference + demo
# ----------------------------------------------------------------------------
def _reference(batch, weight, bias, eps=1e-5):
    mean = jnp.mean(batch, axis=0)
    sqr_mean = jnp.mean(batch * batch, axis=0)
    var = sqr_mean - mean ** 2
    y = (batch - mean) / jnp.sqrt(var + eps)
    return y * weight + bias


if __name__ == "__main__":
    key = jax.random.PRNGKey(0)
    k1, k2, k3, k4 = jax.random.split(key, 4)

    # 1) Main demo: single-pass path, lane-dense feature axis, TILE_D grows to
    #    cover the whole array (one large block, unmasked stores).
    N, DIM = 16, 1024
    x = jax.random.normal(k1, (N, DIM), dtype=jnp.float32) * 2.0 + 0.5
    weight = jnp.ones((DIM,), dtype=jnp.float32)    # torch.ones(dim)
    bias = jnp.zeros((DIM,), dtype=jnp.float32)     # torch.zeros(dim)
    out = jax.block_until_ready(xla_sync_bn(x, weight, bias, eps=1e-5))
    ref = _reference(x, weight, bias, 1e-5)
    assert out.shape == (N, DIM)
    assert bool(jnp.allclose(out, ref, atol=1e-4, rtol=1e-4)), "single-pass mismatch"

    # 2) Single-pass with an artificially small budget: multi-tile D grid with
    #    a ragged (masked) last feature tile.
    N2, D2 = 16, 640
    x2 = jax.random.normal(k2, (N2, D2), dtype=jnp.float32) - 1.5
    w2 = jax.random.normal(k3, (D2,), dtype=jnp.float32) * 0.1 + 1.0
    b2 = jnp.full((D2,), 0.25, dtype=jnp.float32)
    out2 = jax.block_until_ready(
        xla_sync_bn(x2, w2, b2, eps=1e-5, max_block_budget_bytes=120_000))
    assert bool(jnp.allclose(out2, _reference(x2, w2, b2, 1e-5),
                             atol=1e-4, rtol=1e-4)), "tiled single-pass mismatch"

    # 3) Forced two-pass path (the large-N fallback) at a small shape:
    #    ragged N tile (row masking) and ragged D tile.
    N3, D3 = 100, 640
    x3 = jax.random.normal(k4, (N3, D3), dtype=jnp.float32) * 3.0 + 2.0
    out3 = jax.block_until_ready(
        xla_sync_bn(x3, w2, b2, eps=1e-5, two_pass=True))
    assert bool(jnp.allclose(out3, _reference(x3, w2, b2, 1e-5),
                             atol=1e-4, rtol=1e-4)), "two-pass mismatch"

    print("KERNEL_OK")
</pallas_src>

<mosaic_0001>
module attributes {stable_mosaic.version = 11 : i64} {
  func.func @_sync_bn_kernel(%arg0: i32, %arg1: memref<16x1024xf32, #tpu.memory_space<vmem>>, %arg2: memref<1x1024xf32, #tpu.memory_space<vmem>>, %arg3: memref<1x1024xf32, #tpu.memory_space<vmem>>, %arg4: memref<16x1024xf32, #tpu.memory_space<vmem>>) attributes {dimension_semantics = [#tpu.dimension_semantics<parallel>], iteration_bounds = array<i64: 1>, scalar_prefetch = 0 : i64, scratch_operands = 0 : i64, tpu.core_type = #tpu.core_type<tc>, window_params = [{transform_indices = @transform_0, window_bounds = array<i64: 16, 1024>}, {transform_indices = @transform_1, window_bounds = array<i64: 1, 1024>}, {transform_indices = @transform_2, window_bounds = array<i64: 1, 1024>}, {transform_indices = @transform_3, window_bounds = array<i64: 16, 1024>}]} {
    %c0 = arith.constant 0 : index
    %c0_0 = arith.constant 0 : index
    %0 = vector.load %arg1[%c0, %c0_0] : memref<16x1024xf32, #tpu.memory_space<vmem>>, vector<16x1024xf32>
    %cst = arith.constant dense<0.000000e+00> : vector<1024xf32>
    %1 = vector.multi_reduction <add>, %0, %cst [0] : vector<16x1024xf32> to vector<1024xf32>
    %2 = vector.shape_cast %1 : vector<1024xf32> to vector<1x1024xf32>
    %cst_1 = arith.constant 6.250000e-02 : f32
    %3 = vector.broadcast %cst_1 : f32 to vector<1x1024xf32>
    %4 = arith.mulf %2, %3 : vector<1x1024xf32>
    %5 = arith.mulf %0, %0 : vector<16x1024xf32>
    %cst_2 = arith.constant dense<0.000000e+00> : vector<1024xf32>
    %6 = vector.multi_reduction <add>, %5, %cst_2 [0] : vector<16x1024xf32> to vector<1024xf32>
    %7 = vector.shape_cast %6 : vector<1024xf32> to vector<1x1024xf32>
    %cst_3 = arith.constant 6.250000e-02 : f32
    %8 = vector.broadcast %cst_3 : f32 to vector<1x1024xf32>
    %9 = arith.mulf %7, %8 : vector<1x1024xf32>
    %10 = arith.mulf %4, %4 : vector<1x1024xf32>
    %11 = arith.subf %9, %10 : vector<1x1024xf32>
    %cst_4 = arith.constant 0.000000e+00 : f32
    %12 = vector.broadcast %cst_4 : f32 to vector<1x1024xf32>
    %13 = arith.maximumf %11, %12 : vector<1x1024xf32>
    %cst_5 = arith.constant 9.99999974E-6 : f32
    %14 = vector.broadcast %cst_5 : f32 to vector<1x1024xf32>
    %15 = arith.addf %13, %14 : vector<1x1024xf32>
    %16 = math.rsqrt %15 : vector<1x1024xf32>
    %c0_6 = arith.constant 0 : index
    %c0_7 = arith.constant 0 : index
    %17 = vector.load %arg2[%c0_6, %c0_7] : memref<1x1024xf32, #tpu.memory_space<vmem>>, vector<1x1024xf32>
    %18 = arith.mulf %17, %16 : vector<1x1024xf32>
    %c0_8 = arith.constant 0 : index
    %c0_9 = arith.constant 0 : index
    %19 = vector.load %arg3[%c0_8, %c0_9] : memref<1x1024xf32, #tpu.memory_space<vmem>>, vector<1x1024xf32>
    %20 = arith.mulf %4, %18 : vector<1x1024xf32>
    %21 = arith.subf %19, %20 : vector<1x1024xf32>
    %22 = vector.broadcast %18 : vector<1x1024xf32> to vector<16x1024xf32>
    %23 = arith.mulf %0, %22 : vector<16x1024xf32>
    %24 = vector.broadcast %21 : vector<1x1024xf32> to vector<16x1024xf32>
    %25 = arith.addf %23, %24 : vector<16x1024xf32>
    %c0_10 = arith.constant 0 : index
    %c0_11 = arith.constant 0 : index
    %26 = vector.load %arg4[%c0_10, %c0_11] : memref<16x1024xf32, #tpu.memory_space<vmem>>, vector<16x1024xf32>
    tpu.vector_store %arg4[%c0_10, %c0_11], %25 {strides = array<i32>} : memref<16x1024xf32, #tpu.memory_space<vmem>>, vector<16x1024xf32>,
    return
  }
  func.func @transform_0(%arg0: i32) -> (i32, i32) {
    %c0_i32 = arith.constant 0 : i32
    %c0_i32_0 = arith.constant 0 : i32
    return %c0_i32, %arg0 : i32, i32
  }
  func.func @transform_1(%arg0: i32) -> (i32, i32) {
    %c0_i32 = arith.constant 0 : i32
    %c0_i32_0 = arith.constant 0 : i32
    return %c0_i32, %arg0 : i32, i32
  }
  func.func @transform_2(%arg0: i32) -> (i32, i32) {
    %c0_i32 = arith.constant 0 : i32
    %c0_i32_0 = arith.constant 0 : i32
    return %c0_i32, %arg0 : i32, i32
  }
  func.func @transform_3(%arg0: i32) -> (i32, i32) {
    %c0_i32 = arith.constant 0 : i32
    %c0_i32_0 = arith.constant 0 : i32
    return %c0_i32, %arg0 : i32, i32
  }
}

</mosaic_0001>

<bundles_post_ra>
// kernel: tpu_custom_call.1
= control target key start
LH: loop header
LB: loop body
LE: loop exit
PB: predicated region body
PF: predicated region fallthrough
CT: control target
= control target key end

     0   :  { %8 = vsyncpa [#allocation3], 0  ;;  %s910_s0 = inlined_call_operand.hbm [shape: f32[16,1024], index: 0, kind: input, shape index: {}]   ;;  %s911_s1 = inlined_call_operand.hbm [shape: f32[1,1024], index: 1, kind: input, shape index: {}]   ;;  %s912_s2 = inlined_call_operand.hbm [shape: f32[1,1024], index: 2, kind: input, shape index: {}]   ;;  %s913_s3 = inlined_call_operand.hbm [shape: f32[16,1024], index: 3, kind: output, shape index: {}]  }
   0x1   :  { %9 = vsyncpa [#allocation6], 0 }
   0x2   :  { %10 = vsyncpa [#allocation4], 0  ;;  %s645_s12 = smov [#allocation5]   ;;  %s646_s14 = smov [#allocation2]  }
   0x3   :  { %s29_s13 = sshll.u32 %s645_s12, 4  ;;  %s16_s15 = sshll.u32 %s646_s14, 4  ;;  %s30_s13 = int_to_ptr.vmem [resolvable:$true] %s29_s13  ;;  %s672_s15 = int_to_ptr.vmem [resolvable:$true] %s16_s15 }
   0x4   :  { %s551_s18 = scalar_lea.hbm %s911_s1, 128 }
   0x5   :  { %p552_p0 = scmp.ne.s32.totalorder %s911_s1, %s551_s18  ;;  %p555_p1 = scmp.lt.u32.totalorder %s551_s18, %s911_s1 }
   0x7   :  { %p557_p2 = pnand %p555_p1, %p552_p0 }
   0x9   :  { %560 = shalt.err (!%p557_p2)
}
   0xa   :  { %s561_s23 = scalar_lea.vmem %s30_s13, 128  ;;  %p566_p4 = scmp.lt.s32.totalorder %s30_s13, %s30_s13 }
   0xb   :  { %p562_p3 = scmp.ne.s32.totalorder %s30_s13, %s561_s23  ;;  %p567_p5 = scmp.lt.s32.totalorder %s561_s23, %s561_s23 }
   0xd   :  { %p568_p6 = por %p567_p5, %p566_p4 }
   0xf   :  { %p569_p7 = pnand %p568_p6, %p562_p3 }
  0x11   :  { %572 = shalt.err (!%p569_p7)
}
  0x12   :  { %32 = dma.hbm_to_vmem [thread:$0]  %s911_s1, 128, %s30_s13, [#allocation6]  }
  0x13   :  { %s573_s28 = scalar_lea.hbm %s910_s0, 2048 }
  0x14   :  { %p574_p8 = scmp.ne.s32.totalorder %s910_s0, %s573_s28  ;;  %p577_p9 = scmp.lt.u32.totalorder %s573_s28, %s910_s0 }
  0x16   :  { %p579_p10 = pnand %p577_p9, %p574_p8 }
  0x18   :  { %582 = shalt.err (!%p579_p10)
}
  0x19   :  { %s583_s6 = scalar_lea.vmem %s672_s15, 2048  ;;  %p588_p12 = scmp.lt.s32.totalorder %s672_s15, %s672_s15 }
  0x1a   :  { %p584_p11 = scmp.ne.s32.totalorder %s672_s15, %s583_s6  ;;  %p589_p13 = scmp.lt.s32.totalorder %s583_s6, %s583_s6 }
  0x1c   :  { %p590_p0 = por %p589_p13, %p588_p12 }
  0x1e   :  { %p591_p1 = pnand %p590_p0, %p584_p11 }
  0x20   :  { %594 = shalt.err (!%p591_p1)
}
  0x21   :  { %s647_s1 = smov 1024   ;;  %s648_s7 = smov 64  }
  0x22   :  { %22 = dma.hbm_to_vmem [thread:$0]  %s910_s0, 2048, %s672_s15, [#allocation3], %s647_s1, %s647_s1, %s648_s7  }
  0x23   :  { %s649_s10 = smov [#allocation7]   ;;  %s595_s14 = scalar_lea.hbm %s912_s2, 128 }
  0x24   :  { %s39_s11 = sshll.u32 %s649_s10, 4  ;;  %p596_p2 = scmp.ne.s32.totalorder %s912_s2, %s595_s14  ;;  %s40_s11 = int_to_ptr.vmem [resolvable:$true] %s39_s11 }
  0x25   :  { %p599_p3 = scmp.lt.u32.totalorder %s595_s14, %s912_s2 }
  0x27   :  { %p601_p4 = pnand %p599_p3, %p596_p2 }
  0x29   :  { %604 = shalt.err (!%p601_p4)
}
  0x2a   :  { %s605_s20 = scalar_lea.vmem %s40_s11, 128  ;;  %p610_p6 = scmp.lt.s32.totalorder %s40_s11, %s40_s11 }
  0x2b   :  { %p606_p5 = scmp.ne.s32.totalorder %s40_s11, %s605_s20  ;;  %p611_p7 = scmp.lt.s32.totalorder %s605_s20, %s605_s20 }
  0x2d   :  { %p612_p8 = por %p611_p7, %p610_p6 }
  0x2f   :  { %p613_p9 = pnand %p612_p8, %p606_p5 }
  0x31   :  { %616 = shalt.err (!%p613_p9)
}
  0x32   :  { %42 = dma.hbm_to_vmem [thread:$0]  %s912_s2, 128, %s40_s11, [#allocation6]  }
  0x33   :  { %639 = dma.done.wait [#allocation3], 2048  }
  0x34   :  { %640 = vsyncadd [#allocation3], 4294965248 }
  0x35   :  { %641 = dma.done.wait [#allocation6], 256  }
  0x36   :  { %642 = vsyncadd [#allocation6], 4294967040  ;;  %v718_v0 = vld [vmem:[#allocation2] sm:$0xff]  ;;  %v720_v1 = vld [vmem:[#allocation2 + $0x8] sm:$0xff]  ;;  %s651_s2 = smov [#allocation8]  }
  0x37   :  { %v722_v2 = vld [vmem:[#allocation2 + $0x10] sm:$0xff]  ;;  %v724_v3 = vld [vmem:[#allocation2 + $0x18] sm:$0xff]  ;;  %v726_v4 = vld [vmem:[#allocation2 + $0x20] sm:$0xff]  ;;  %v732_v6 = vmul.f32 %v718_v0, %v718_v0  ;;  %v736_v7 = vmul.f32 %v720_v1, %v720_v1  ;;  %s515_s21 = sshll.u32 %s651_s2, 4  ;;  %s516_s21 = int_to_ptr.vmem [resolvable:$true] %s515_s21 }
  0x38   :  { %v728_v5 = vld [vmem:[#allocation2 + $0x28] sm:$0xff]  ;;  %v738_v8 = vld [vmem:[#allocation2 + $0x30] sm:$0xff]  ;;  %v740_v9 = vld [vmem:[#allocation2 + $0x38] sm:$0xff]  ;;  %v746_v11 = vmul.f32 %v722_v2, %v722_v2  ;;  %v750_v12 = vmul.f32 %v724_v3, %v724_v3  ;;  %v754_v13 = vmul.f32 %v726_v4, %v726_v4  ;;  %s617_s22 = scalar_lea.vmem %s516_s21, 2048  ;;  %p622_p11 = scmp.lt.s32.totalorder %s516_s21, %s516_s21 }
  0x39   :  { %v742_v10 = vld [vmem:[#allocation2 + $0x40] sm:$0xff]  ;;  %v758_v14 = vmul.f32 %v728_v5, %v728_v5  ;;  %v760_v15 = vld [vmem:[#allocation2 + $0x48] sm:$0xff]  ;;  %v762_v16 = vld [vmem:[#allocation2 + $0x50] sm:$0xff]  ;;  %v770_v19 = vmul.f32 %v738_v8, %v738_v8  ;;  %v774_v20 = vmul.f32 %v740_v9, %v740_v9  ;;  %p618_p10 = scmp.ne.s32.totalorder %s516_s21, %s617_s22  ;;  %p623_p12 = scmp.lt.s32.totalorder %s617_s22, %s617_s22 }
  0x3a   :  { %v764_v17 = vld [vmem:[#allocation2 + $0x58] sm:$0xff]  ;;  %v68_v18 = vadd.f32 %v742_v10, %v718_v0  ;;  %v778_v21 = vmul.f32 %v742_v10, %v742_v10  ;;  %v780_v22 = vld [vmem:[#allocation2 + $0x60] sm:$0xff]  ;;  %v782_v23 = vld [vmem:[#allocation2 + $0x68] sm:$0xff]  ;;  %v75_v25 = vadd.f32 %v760_v15, %v720_v1  ;;  %v82_v26 = vadd.f32 %v762_v16, %v722_v2 }
  0x3b   :  { %v784_v24 = vld [vmem:[#allocation2 + $0x70] sm:$0xff]  ;;  %v89_v27 = vadd.f32 %v764_v17, %v724_v3  ;;  %v794_v28 = vmul.f32 %v760_v15, %v760_v15  ;;  %v796_v29 = vld [vmem:[#allocation2 + $0x78] sm:$0xff]  ;;  %v96_v31 = vadd.f32 %v780_v22, %v726_v4  ;;  %v103_v32 = vadd.f32 %v782_v23, %v728_v5  ;;  %p624_p13 = por %p623_p12, %p622_p11 }
  0x3c   :  { %v69_v30 = vrot.slane %v68_v18, 4  ;;  %v110_v33 = vadd.f32 %v784_v24, %v738_v8  ;;  %v76_v34 = vrot.slane %v75_v25, 4  ;;  %v83_v35 = vrot.slane %v82_v26, 4 }
  0x3d   :  { %v90_v36 = vrot.slane %v89_v27, 4  ;;  %v117_v37 = vadd.f32 %v796_v29, %v740_v9  ;;  %v97_v39 = vrot.slane %v96_v31, 4  ;;  %v104_v40 = vrot.slane %v103_v32, 4  ;;  %p625_p0 = pnand %p624_p13, %p618_p10 }
  0x3e   :  { %v70_v38 = vadd.f32 %v69_v30, %v68_v18  ;;  %v111_v41 = vrot.slane %v110_v33, 4  ;;  %v77_v42 = vadd.f32 %v76_v34, %v75_v25  ;;  %v84_v43 = vadd.f32 %v83_v35, %v82_v26 }
  0x3f   :  { %v91_v44 = vadd.f32 %v90_v36, %v89_v27  ;;  %v118_v45 = vrot.slane %v117_v37, 4  ;;  %v98_v47 = vadd.f32 %v97_v39, %v96_v31  ;;  %v105_v48 = vadd.f32 %v104_v40, %v103_v32 }
  0x40   :  { %v71_v46 = vrot.slane %v70_v38, 2  ;;  %v112_v49 = vadd.f32 %v111_v41, %v110_v33  ;;  %v78_v50 = vrot.slane %v77_v42, 2  ;;  %v85_v51 = vrot.slane %v84_v43, 2 }
  0x41   :  { %v92_v52 = vrot.slane %v91_v44, 2  ;;  %v119_v53 = vadd.f32 %v118_v45, %v117_v37  ;;  %v99_v55 = vrot.slane %v98_v47, 2  ;;  %v106_v56 = vrot.slane %v105_v48, 2 }
  0x42   :  { %v72_v54 = vadd.f32 %v71_v46, %v70_v38  ;;  %v113_v57 = vrot.slane %v112_v49, 2  ;;  %v79_v58 = vadd.f32 %v78_v50, %v77_v42  ;;  %v86_v59 = vadd.f32 %v85_v51, %v84_v43 }
  0x43   :  { %v93_v60 = vadd.f32 %v92_v52, %v91_v44  ;;  %v120_v61 = vrot.slane %v119_v53, 2  ;;  %v100_v63 = vadd.f32 %v99_v55, %v98_v47  ;;  %v107_v18 = vadd.f32 %v106_v56, %v105_v48 }
  0x44   :  { %v73_v62 = vrot.slane %v72_v54, 1  ;;  %v114_v25 = vadd.f32 %v113_v57, %v112_v49  ;;  %v80_v26 = vrot.slane %v79_v58, 1  ;;  %v87_v27 = vrot.slane %v86_v59, 1 }
  0x45   :  { %v94_v30 = vrot.slane %v93_v60, 1  ;;  %v121_v31 = vadd.f32 %v120_v61, %v119_v53  ;;  %v101_v33 = vrot.slane %v100_v63, 1  ;;  %v108_v34 = vrot.slane %v107_v18, 1 }
  0x46   :  { %v74_v32 = vadd.f32 %v73_v62, %v72_v54  ;;  %v115_v35 = vrot.slane %v114_v25, 1  ;;  %v81_v36 = vadd.f32 %v80_v26, %v79_v58  ;;  %v88_v37 = vadd.f32 %v87_v27, %v86_v59 }
  0x47   :  { %v95_v38 = vadd.f32 %v94_v30, %v93_v60  ;;  %v122_v39 = vrot.slane %v121_v31, 1  ;;  %v102_v40 = vadd.f32 %v101_v33, %v100_v63  ;;  %v109_v41 = vadd.f32 %v108_v34, %v107_v18 }
  0x48   :  { %v116_v42 = vadd.f32 %v115_v35, %v114_v25  ;;  %v806_v43 = vmul.f32 0.0625, %v74_v32  ;;  %v808_v45 = vmul.f32 0.0625, %v81_v36  ;;  %v810_v46 = vmul.f32 0.0625, %v88_v37 }
  0x49   :  { %v123_v44 = vadd.f32 %v122_v39, %v121_v31  ;;  %v812_v47 = vmul.f32 0.0625, %v95_v38  ;;  %v814_v48 = vmul.f32 0.0625, %v102_v40  ;;  %v816_v49 = vmul.f32 0.0625, %v109_v41 }
  0x4a   :  { %v818_v50 = vmul.f32 0.0625, %v116_v42  ;;  %v142_v51 = vmul.f32 %v762_v16, %v762_v16  ;;  %v143_v53 = vmul.f32 %v764_v17, %v764_v17  ;;  %v144_v54 = vmul.f32 %v780_v22, %v780_v22 }
  0x4b   :  { %v822_v52 = vmul.f32 0.0625, %v123_v44  ;;  %v145_v55 = vmul.f32 %v782_v23, %v782_v23  ;;  %v146_v56 = vmul.f32 %v784_v24, %v784_v24  ;;  %v147_v57 = vmul.f32 %v796_v29, %v796_v29 }
  0x4c   :  { %v148_v58 = vadd.f32 %v778_v21, %v732_v6  ;;  %v155_v59 = vadd.f32 %v794_v28, %v736_v7  ;;  %v162_v60 = vadd.f32 %v142_v51, %v746_v11  ;;  %v169_v61 = vadd.f32 %v143_v53, %v750_v12 }
  0x4d   :  { %v176_v62 = vadd.f32 %v144_v54, %v754_v13  ;;  %v183_v63 = vadd.f32 %v145_v55, %v758_v14  ;;  %v190_v26 = vadd.f32 %v146_v56, %v770_v19  ;;  %v197_v27 = vadd.f32 %v147_v57, %v774_v20 }
  0x4e   :  { %v149_v18 = vrot.slane %v148_v58, 4  ;;  %v156_v25 = vrot.slane %v155_v59, 4  ;;  %v163_v30 = vrot.slane %v162_v60, 4  ;;  %v170_v31 = vrot.slane %v169_v61, 4 }
  0x4f   :  { %v177_v6 = vrot.slane %v176_v62, 4  ;;  %v184_v21 = vrot.slane %v183_v63, 4  ;;  %v191_v28 = vrot.slane %v190_v26, 4  ;;  %v198_v11 = vrot.slane %v197_v27, 4 }
  0x50   :  { %v150_v32 = vadd.f32 %v149_v18, %v148_v58  ;;  %v157_v7 = vadd.f32 %v156_v25, %v155_v59  ;;  %v164_v33 = vadd.f32 %v163_v30, %v162_v60  ;;  %v171_v12 = vadd.f32 %v170_v31, %v169_v61 }
  0x51   :  { %v178_v34 = vadd.f32 %v177_v6, %v176_v62  ;;  %v185_v13 = vadd.f32 %v184_v21, %v183_v63  ;;  %v192_v36 = vadd.f32 %v191_v28, %v190_v26  ;;  %v199_v37 = vadd.f32 %v198_v11, %v197_v27 }
  0x52   :  { %v151_v35 = vrot.slane %v150_v32, 2  ;;  %v158_v14 = vrot.slane %v157_v7, 2  ;;  %v165_v38 = vrot.slane %v164_v33, 2  ;;  %v172_v19 = vrot.slane %v171_v12, 2 }
  0x53   :  { %v179_v39 = vrot.slane %v178_v34, 2  ;;  %v186_v20 = vrot.slane %v185_v13, 2  ;;  %v193_v42 = vrot.slane %v192_v36, 2  ;;  %v200_v44 = vrot.slane %v199_v37, 2 }
  0x54   :  { %v152_v40 = vadd.f32 %v151_v35, %v150_v32  ;;  %v159_v41 = vadd.f32 %v158_v14, %v157_v7  ;;  %v166_v51 = vadd.f32 %v165_v38, %v164_v33  ;;  %v173_v53 = vadd.f32 %v172_v19, %v171_v12 }
  0x55   :  { %v180_v54 = vadd.f32 %v179_v39, %v178_v34  ;;  %v187_v55 = vadd.f32 %v186_v20, %v185_v13  ;;  %v194_v58 = vadd.f32 %v193_v42, %v192_v36  ;;  %v201_v59 = vadd.f32 %v200_v44, %v199_v37 }
  0x56   :  { %v153_v56 = vrot.slane %v152_v40, 1  ;;  %v160_v57 = vrot.slane %v159_v41, 1  ;;  %v167_v60 = vrot.slane %v166_v51, 1  ;;  %v174_v61 = vrot.slane %v173_v53, 1 }
  0x57   :  { %v181_v62 = vrot.slane %v180_v54, 1  ;;  %v188_v63 = vrot.slane %v187_v55, 1  ;;  %v195_v26 = vrot.slane %v194_v58, 1  ;;  %v202_v27 = vrot.slane %v201_v59, 1 }
  0x58   :  { %v154_v18 = vadd.f32 %v153_v56, %v152_v40  ;;  %v161_v25 = vadd.f32 %v160_v57, %v159_v41  ;;  %v168_v30 = vadd.f32 %v167_v60, %v166_v51  ;;  %v175_v31 = vadd.f32 %v174_v61, %v173_v53 }
  0x59   :  { %v182_v6 = vadd.f32 %v181_v62, %v180_v54  ;;  %v189_v21 = vadd.f32 %v188_v63, %v187_v55  ;;  %v196_v32 = vadd.f32 %v195_v26, %v194_v58  ;;  %v203_v7 = vadd.f32 %v202_v27, %v201_v59 }
  0x5a   :  { %v204_v28 = vmul.f32 0.0625, %v154_v18  ;;  %v205_v11 = vmul.f32 0.0625, %v161_v25  ;;  %v206_v33 = vmul.f32 0.0625, %v168_v30  ;;  %v207_v12 = vmul.f32 0.0625, %v175_v31 }
  0x5b   :  { %v208_v34 = vmul.f32 0.0625, %v182_v6  ;;  %v209_v13 = vmul.f32 0.0625, %v189_v21  ;;  %v210_v35 = vmul.f32 0.0625, %v196_v32  ;;  %v211_v14 = vmul.f32 0.0625, %v203_v7 }
  0x5c   :  { %v212_v36 = vmul.f32 %v806_v43, %v806_v43  ;;  %v213_v37 = vmul.f32 %v808_v45, %v808_v45  ;;  %v214_v38 = vmul.f32 %v810_v46, %v810_v46  ;;  %v215_v19 = vmul.f32 %v812_v47, %v812_v47 }
  0x5d   :  { %v216_v39 = vmul.f32 %v814_v48, %v814_v48  ;;  %v217_v20 = vmul.f32 %v816_v49, %v816_v49  ;;  %v218_v40 = vmul.f32 %v818_v50, %v818_v50  ;;  %v219_v41 = vmul.f32 %v822_v52, %v822_v52 }
  0x5e   :  { %v220_v42 = vsub.f32 %v204_v28, %v212_v36  ;;  %v221_v44 = vsub.f32 %v205_v11, %v213_v37  ;;  %v222_v51 = vsub.f32 %v206_v33, %v214_v38  ;;  %v223_v53 = vsub.f32 %v207_v12, %v215_v19 }
  0x5f   :  { %v224_v54 = vsub.f32 %v208_v34, %v216_v39  ;;  %v225_v55 = vsub.f32 %v209_v13, %v217_v20  ;;  %v226_v56 = vsub.f32 %v210_v35, %v218_v40  ;;  %v227_v57 = vsub.f32 %v211_v14, %v219_v41 }
  0x60   :  { %v228_v58 = vmax.f32 %v220_v42, 0.0  ;;  %v229_v59 = vmax.f32 %v221_v44, 0.0  ;;  %v230_v60 = vmax.f32 %v222_v51, 0.0  ;;  %v231_v61 = vmax.f32 %v223_v53, 0.0 }
  0x61   :  { %v232_v62 = vmax.f32 %v224_v54, 0.0  ;;  %v233_v63 = vmax.f32 %v225_v55, 0.0  ;;  %v234_v18 = vmax.f32 %v226_v56, 0.0  ;;  %v235_v27 = vmax.f32 %v227_v57, 0.0 }
  0x62   :  { %v236_v25 = vadd.f32 1e-05, %v228_v58  ;;  %v237_v26 = vadd.f32 1e-05, %v229_v59  ;;  %v238_v30 = vadd.f32 1e-05, %v230_v60  ;;  %v268_v11 = vlaneseq }
  0x63   :  { %v239_v31 = vadd.f32 1e-05, %v231_v61  ;;  %v240_v6 = vadd.f32 1e-05, %v232_v62  ;;  %v241_v21 = vadd.f32 1e-05, %v233_v63 }
  0x64   :  { %535 = vrsqrt.f32 %v236_v25  ;;  %v242_v32 = vadd.f32 1e-05, %v234_v18  ;;  %v650_v7 = vmov 1966171168   ;;  %v243_v33 = vadd.f32 1e-05, %v235_v27 }
  0x65   :  { %537 = vrsqrt.f32 %v237_v26  ;;  %v266_v28 = vunpack.c.l.s4 %v650_v7  ;;  %v860_v34 = vshrl.u32 %v268_v11, 7  ;;  %v252_v60 = vld [vmem:[#allocation5] sm:$0xff] }
  0x66   :  { %539 = vrsqrt.f32 %v238_v30 }
  0x67   :  { %541 = vrsqrt.f32 %v239_v31  ;;  %v267_v12 = vunpack.c.0.s8 %v266_v28  ;;  %v316_v61 = vsub.s32 0, %v860_v34  ;;  %v320_v63 = vsub.s32 1, %v860_v34 }
  0x68   :  { %543 = vrsqrt.f32 %v240_v6  ;;  %v324_v18 = vsub.s32 2, %v860_v34  ;;  %v328_v25 = vsub.s32 3, %v860_v34  ;;  %v332_v26 = vsub.s32 4, %v860_v34 }
  0x69   :  { %545 = vrsqrt.f32 %v241_v21  ;;  %v270_v35 = vsub.s32 %v267_v12, %v860_v34  ;;  %v336_v27 = vsub.s32 5, %v860_v34  ;;  %v340_v30 = vsub.s32 6, %v860_v34 }
  0x6a   :  { %547 = vrsqrt.f32 %v242_v32  ;;  %v344_v31 = vsub.s32 7, %v860_v34 }
  0x6b   :  { %549 = vrsqrt.f32 %v243_v33 }
  0x6e   :  { %v536_v13 = vpop.eup %535 }
  0x6f   :  { %v538_v14 = vpop.eup %537 }
  0x70   :  { %v540_v36 = vpop.eup %539  ;;  %v261_v37 = vcombine.low %v536_v13, %v538_v14 }
  0x71   :  { %v542_v38 = vpop.eup %541 }
  0x72   :  { %v544_v19 = vpop.eup %543  ;;  %v262_v39 = vcombine.low %v540_v36, %v542_v38  ;;  %v271_v20 = vrot.slane %v261_v37, %v270_v35 }
  0x73   :  { %v546_v40 = vpop.eup %545 }
  0x74   :  { %v548_v41 = vpop.eup %547  ;;  %v263_v42 = vcombine.low %v544_v19, %v546_v40  ;;  %v278_v44 = vrot.slane %v262_v39, %v270_v35 }
  0x75   :  { %v550_v51 = vpop.eup %549 }
  0x76   :  { %v264_v53 = vcombine.low %v548_v41, %v550_v51  ;;  %v285_v54 = vrot.slane %v263_v42, %v270_v35  ;;  %v293_v55 = vcombine.low %v271_v20, %v278_v44 }
  0x78   :  { %v292_v56 = vrot.slane %v264_v53, %v270_v35  ;;  %v301_v58 = vrot.slane %v293_v55, %v270_v35 }
  0x7a   :  { %v294_v57 = vcombine.low %v285_v54, %v292_v56  ;;  %v312_v56 = vld [vmem:[#allocation7] sm:$0xff] }
  0x7c   :  { %v308_v59 = vrot.slane %v294_v57, %v270_v35 }
  0x7e   :  { %v309_v62 = vcombine.low %v301_v58, %v308_v59 }
  0x80   :  { %v311_v6 = vmul.f32 %v309_v62, %v252_v60 }
  0x82   :  { %v317_v21 = vrot.slane %v311_v6, %v316_v61  ;;  %v321_v32 = vrot.slane %v311_v6, %v320_v63  ;;  %v325_v7 = vrot.slane %v311_v6, %v324_v18  ;;  %v329_v28 = vrot.slane %v311_v6, %v328_v25 }
  0x83   :  { %v333_v11 = vrot.slane %v311_v6, %v332_v26  ;;  %v337_v33 = vrot.slane %v311_v6, %v336_v27  ;;  %v341_v12 = vrot.slane %v311_v6, %v340_v30  ;;  %v345_v13 = vrot.slane %v311_v6, %v344_v31 }
  0x84   :  { %v354_v14 = vmul.f32 %v317_v21, %v806_v43  ;;  %v355_v36 = vmul.f32 %v321_v32, %v808_v45  ;;  %v356_v37 = vmul.f32 %v325_v7, %v810_v46  ;;  %v357_v38 = vmul.f32 %v329_v28, %v812_v47 }
  0x85   :  { %v358_v19 = vmul.f32 %v333_v11, %v814_v48  ;;  %v359_v34 = vmul.f32 %v337_v33, %v816_v49  ;;  %v360_v39 = vmul.f32 %v341_v12, %v818_v50  ;;  %v361_v20 = vmul.f32 %v345_v13, %v822_v52 }
  0x86   :  { %v370_v40 = vcombine.low %v354_v14, %v355_v36  ;;  %v371_v41 = vcombine.low %v356_v37, %v357_v38  ;;  %v421_v48 = vmul.f32 %v317_v21, %v718_v0  ;;  %v422_v49 = vmul.f32 %v321_v32, %v720_v1 }
  0x87   :  { %v372_v42 = vcombine.low %v358_v19, %v359_v34  ;;  %v373_v44 = vcombine.low %v360_v39, %v361_v20  ;;  %v423_v52 = vmul.f32 %v325_v7, %v722_v2  ;;  %v424_v57 = vmul.f32 %v329_v28, %v724_v3 }
  0x88   :  { %v380_v51 = vrot.slane %v370_v40, %v270_v35  ;;  %v387_v43 = vrot.slane %v371_v41, %v270_v35  ;;  %v425_v58 = vmul.f32 %v333_v11, %v726_v4  ;;  %v426_v59 = vmul.f32 %v337_v33, %v728_v5 }
  0x89   :  { %v394_v53 = vrot.slane %v372_v42, %v270_v35  ;;  %v401_v45 = vrot.slane %v373_v44, %v270_v35  ;;  %v427_v60 = vmul.f32 %v341_v12, %v738_v8  ;;  %v428_v62 = vmul.f32 %v345_v13, %v740_v9 }
  0x8a   :  { %v402_v54 = vcombine.low %v380_v51, %v387_v43  ;;  %v430_v0 = vmul.f32 %v321_v32, %v760_v15  ;;  %v431_v1 = vmul.f32 %v325_v7, %v762_v16  ;;  %v432_v14 = vmul.f32 %v329_v28, %v764_v17 }
  0x8b   :  { %v403_v46 = vcombine.low %v394_v53, %v401_v45  ;;  %v433_v2 = vmul.f32 %v333_v11, %v780_v22  ;;  %v434_v3 = vmul.f32 %v337_v33, %v782_v23  ;;  %v435_v4 = vmul.f32 %v341_v12, %v784_v24 }
  0x8c   :  { %v410_v55 = vrot.slane %v402_v54, %v270_v35  ;;  %v436_v5 = vmul.f32 %v345_v13, %v796_v29 }
  0x8d   :  { %v417_v47 = vrot.slane %v403_v46, %v270_v35  ;;  %v429_v35 = vmul.f32 %v317_v21, %v742_v10 }
  0x8f   :  { %v418_v50 = vcombine.low %v410_v55, %v417_v47 }
  0x91   :  { %v420_v6 = vsub.f32 %v312_v56, %v418_v50 }
  0x93   :  { %v441_v8 = vrot.slane %v420_v6, %v316_v61  ;;  %v445_v36 = vrot.slane %v420_v6, %v320_v63  ;;  %v449_v9 = vrot.slane %v420_v6, %v324_v18  ;;  %v453_v37 = vrot.slane %v420_v6, %v328_v25 }
  0x94   :  { %v457_v10 = vrot.slane %v420_v6, %v332_v26  ;;  %v461_v21 = vrot.slane %v420_v6, %v336_v27  ;;  %v465_v38 = vrot.slane %v420_v6, %v340_v30  ;;  %v469_v15 = vrot.slane %v420_v6, %v344_v31 }
  0x95   :  { %v478_v32 = vadd.f32 %v441_v8, %v421_v48  ;;  %v479_v16 = vadd.f32 %v445_v36, %v422_v49  ;;  %v480_v7 = vadd.f32 %v449_v9, %v423_v52  ;;  %v481_v17 = vadd.f32 %v453_v37, %v424_v57 }
  0x96   :  { %v482_v22 = vadd.f32 %v457_v10, %v425_v58  ;;  %v483_v23 = vadd.f32 %v461_v21, %v426_v59  ;;  %v484_v28 = vadd.f32 %v465_v38, %v427_v60  ;;  %v485_v24 = vadd.f32 %v469_v15, %v428_v62 }
  0x97   :  { %494 = vst [vmem:[#allocation8] sm:$0xff] %v478_v32  ;;  %495 = vst [vmem:[#allocation8 + $0x8] sm:$0xff] %v479_v16  ;;  %v486_v29 = vadd.f32 %v441_v8, %v429_v35  ;;  %v487_v61 = vadd.f32 %v445_v36, %v430_v0  ;;  %v488_v63 = vadd.f32 %v449_v9, %v431_v1 }
  0x98   :  { %496 = vst [vmem:[#allocation8 + $0x10] sm:$0xff] %v480_v7  ;;  %497 = vst [vmem:[#allocation8 + $0x18] sm:$0xff] %v481_v17  ;;  %v489_v18 = vadd.f32 %v453_v37, %v432_v14  ;;  %v490_v25 = vadd.f32 %v457_v10, %v433_v2  ;;  %v491_v26 = vadd.f32 %v461_v21, %v434_v3 }
  0x99   :  { %498 = vst [vmem:[#allocation8 + $0x20] sm:$0xff] %v482_v22  ;;  %499 = vst [vmem:[#allocation8 + $0x28] sm:$0xff] %v483_v23  ;;  %v492_v27 = vadd.f32 %v465_v38, %v435_v4  ;;  %v493_v30 = vadd.f32 %v469_v15, %v436_v5 }
  0x9a   :  { %500 = vst [vmem:[#allocation8 + $0x30] sm:$0xff] %v484_v28  ;;  %501 = vst [vmem:[#allocation8 + $0x38] sm:$0xff] %v485_v24 }
  0x9b   :  { %502 = vst [vmem:[#allocation8 + $0x40] sm:$0xff] %v486_v29  ;;  %503 = vst [vmem:[#allocation8 + $0x48] sm:$0xff] %v487_v61 }
  0x9c   :  { %504 = vst [vmem:[#allocation8 + $0x50] sm:$0xff] %v488_v63  ;;  %505 = vst [vmem:[#allocation8 + $0x58] sm:$0xff] %v489_v18 }
  0x9d   :  { %506 = vst [vmem:[#allocation8 + $0x60] sm:$0xff] %v490_v25  ;;  %507 = vst [vmem:[#allocation8 + $0x68] sm:$0xff] %v491_v26 }
  0x9e   :  { %508 = vst [vmem:[#allocation8 + $0x70] sm:$0xff] %v492_v27  ;;  %509 = vst [vmem:[#allocation8 + $0x78] sm:$0xff] %v493_v30 }
  0x9f   :  { %628 = shalt.err (!%p625_p0)
}
  0xa0   :  { %s629_s25 = scalar_lea.hbm %s913_s3, 2048 }
  0xa1   :  { %p630_p1 = scmp.ne.s32.totalorder %s913_s3, %s629_s25  ;;  %p633_p2 = scmp.lt.u32.totalorder %s629_s25, %s913_s3 }
  0xa3   :  { %p635_p3 = pnand %p633_p2, %p630_p1 }
  0xa5   :  { %638 = shalt.err (!%p635_p3)
}
  0xa6   :  { %521 = dma.vmem_to_hbm [thread:$0]  %s516_s21, 2048, %s913_s3, [#allocation4], %s647_s1, %s647_s1, %s648_s7  }
  0xa7   :  { %643 = dma.done.wait [#allocation4], 2048  }
  0xa8   :  { %644 = vsyncadd [#allocation4], 4294965248 }
  0xa9   :  { %525 = vsyncpa [#allocation3], 1 }
  0xaa   :  { %526 = vsyncpa [#allocation6], 1 }
  0xab   :  { %527 = vsyncpa [#allocation4], 1 }

</bundles_post_ra>
